<compile_context>
chip_gen: v7x
topology: tpu7x:2x2x1
jax: 0.10.0
libtpu: 0.0.40
codegen_flags: <defaults>
</compile_context>

<pallas_src>
import jax
import jax.numpy as jnp
from jax.experimental import pallas as pl
from jax.experimental.pallas import tpu as pltpu

F_IN = 25        # tabular features
F_PAD = 32       # padded feature dim (sublane-friendly K for layer 1)
H1 = 512
H2 = 128
N_OUT = 3
N_OUT_PAD = 128  # lane-dense padded output width
BN_EPS = 1e-5


def _round_up(x, m):
    return ((x + m - 1) // m) * m


# ----------------------------------------------------------------------------
# Kernel
# ----------------------------------------------------------------------------
def _tabular_kernel(x_ref, w1_ref, b1_ref, w2_ref, b2_ref, w3_ref, b3_ref,
                    o_ref):
    # x: (TB, 32) bf16 (padded + cast in the wrapper).
    x = x_ref[...]

    # Linear(25->512) with BN1 pre-folded into w1/b1, then ReLU.  f32 acc.
    h1 = jnp.dot(x, w1_ref[...], preferred_element_type=jnp.float32)
    h1 = jnp.maximum(h1 + b1_ref[...], 0.0)                      # (TB, 512) f32

    # Linear(512->128) with BN2 (which follows it) pre-folded, then ReLU.
    h2 = jnp.dot(h1.astype(jnp.bfloat16), w2_ref[...],
                 preferred_element_type=jnp.float32)
    h2 = jnp.maximum(h2 + b2_ref[...], 0.0)                      # (TB, 128) f32

    # Linear(128->3), lane-padded to 128 output columns (cols 3.. are zero).
    o_ref[...] = (jnp.dot(h2.astype(jnp.bfloat16), w3_ref[...],
                          preferred_element_type=jnp.float32)
                  + b3_ref[...])                                 # (TB, 128) f32


# ----------------------------------------------------------------------------
# Wrapper
# ----------------------------------------------------------------------------
def tabular_model_forward(img, tabular, prepared, *, tb=512):
    """Fused forward. `img` is accepted for API parity but unused (as in the
    PyTorch module)."""
    del img
    B, F = tabular.shape
    assert F == F_IN, F
    w1, b1, w2, b2, w3, b3 = prepared

    # Batch tile: multiple of 8, at most `tb` (>=256 keeps the MXU M-dim busy
    # on v6e/v7x at large batch; small demo batches just use one small tile).
    TB = min(tb, _round_up(B, 8))
    B_pad = _round_up(B, TB)
    n_blocks = B_pad // TB

    # Zero-pad batch (to a tile multiple) and features (25 -> 32), cast bf16.
    x = jnp.pad(tabular.astype(jnp.bfloat16),
                ((0, B_pad - B), (0, F_PAD - F_IN)))

    const_spec = lambda a: pl.BlockSpec(a.shape, lambda i: (0,) * a.ndim)

    flops = 2 * B_pad * (F_PAD * H1 + H1 * H2 + H2 * N_OUT_PAD)
    bytes_accessed = (x.size * 2 + B_pad * N_OUT_PAD * 4
                      + (w1.size + w2.size + w3.size) * 2
                      + (b1.size + b2.size + b3.size) * 4)

    out = pl.pallas_call(
        _tabular_kernel,
        out_shape=jax.ShapeDtypeStruct((B_pad, N_OUT_PAD), jnp.float32),
        grid=(n_blocks,),
        in_specs=[
            pl.BlockSpec((TB, F_PAD), lambda i: (i, 0)),   # x tile (pipelined)
            const_spec(w1), const_spec(b1),                # weights stay resident
            const_spec(w2), const_spec(b2),
            const_spec(w3), const_spec(b3),
        ],
        out_specs=pl.BlockSpec((TB, N_OUT_PAD), lambda i: (i, 0)),
        compiler_params=pltpu.CompilerParams(
            dimension_semantics=("parallel",)),
        cost_estimate=pl.CostEstimate(flops=flops, transcendentals=0,
                                      bytes_accessed=bytes_accessed),
    )(x, w1, b1, w2, b2, w3, b3)

    return out[:B, :N_OUT]


# ----------------------------------------------------------------------------
# Parameters
# ----------------------------------------------------------------------------
def make_params(key):
    """Raw parameters matching TabularModel.__init__ (weights stored (in,out))."""
    ks = jax.random.split(key, 6)

    def linear(kw, kb, fan_in, fan_out):
        bound = 1.0 / jnp.sqrt(fan_in)
        w = jax.random.uniform(kw, (fan_in, fan_out), jnp.float32, -bound, bound)
        b = jax.random.uniform(kb, (fan_out,), jnp.float32, -bound, bound)
        return w, b

    w1, b1 = linear(ks[0], ks[1], F_IN, H1)
    w2, b2 = linear(ks[2], ks[3], H1, H2)
    w3, b3 = linear(ks[4], ks[5], H2, N_OUT)

    def bn(n):  # PyTorch eval-mode defaults
        return dict(gamma=jnp.ones((n,), jnp.float32),
                    beta=jnp.zeros((n,), jnp.float32),
                    mean=jnp.zeros((n,), jnp.float32),
                    var=jnp.ones((n,), jnp.float32))

    return dict(w1=w1, b1=b1, bn1=bn(H1),
                w2=w2, b2=b2, bn2=bn(H2),
                w3=w3, b3=b3)


def prepare_params(raw):
    """Fold BatchNorm into the Linear weights, pad for tile alignment, and
    cast weights to bf16 (biases stay f32)."""
    def fold(w, b, bn):
        # BN follows the Linear: y = (Wx + b) * scale + shift.
        scale = bn["gamma"] / jnp.sqrt(bn["var"] + BN_EPS)
        shift = bn["beta"] - bn["mean"] * scale
        return w * scale[None, :], b * scale + shift

    w1f, b1f = fold(raw["w1"], raw["b1"], raw["bn1"])
    w2f, b2f = fold(raw["w2"], raw["b2"], raw["bn2"])

    # Pad layer-1 K: 25 -> 32 (zero rows contribute nothing).
    w1p = jnp.zeros((F_PAD, H1), jnp.float32).at[:F_IN, :].set(w1f)
    # Pad layer-3 N: 3 -> 128 (zero columns, zero bias).
    w3p = jnp.zeros((H2, N_OUT_PAD), jnp.float32).at[:, :N_OUT].set(raw["w3"])
    b3p = jnp.zeros((N_OUT_PAD,), jnp.float32).at[:N_OUT].set(raw["b3"])

    return (w1p.astype(jnp.bfloat16), b1f.reshape(1, H1),
            w2f.astype(jnp.bfloat16), b2f.reshape(1, H2),
            w3p.astype(jnp.bfloat16), b3p.reshape(1, N_OUT_PAD))


# ----------------------------------------------------------------------------
# References
# ----------------------------------------------------------------------------
def reference_forward_f32(tabular, raw):
    """Plain-JAX f32 reference of the original module semantics."""
    def bn_apply(x, bn):
        return (x - bn["mean"]) / jnp.sqrt(bn["var"] + BN_EPS) * bn["gamma"] + bn["beta"]

    h = tabular @ raw["w1"] + raw["b1"]
    h = jnp.maximum(bn_apply(h, raw["bn1"]), 0.0)
    h = h @ raw["w2"] + raw["b2"]
    h = jnp.maximum(bn_apply(h, raw["bn2"]), 0.0)
    return h @ raw["w3"] + raw["b3"]


def reference_forward_bf16(tabular, prepared):
    """Reference mirroring the kernel's exact math (bf16 operands, f32 acc)."""
    w1, b1, w2, b2, w3, b3 = prepared
    B = tabular.shape[0]
    x = jnp.zeros((B, F_PAD), jnp.float32).at[:, :F_IN].set(tabular)
    h1 = jnp.maximum(jnp.dot(x.astype(jnp.bfloat16), w1,
                             preferred_element_type=jnp.float32) + b1, 0.0)
    h2 = jnp.maximum(jnp.dot(h1.astype(jnp.bfloat16), w2,
                             preferred_element_type=jnp.float32) + b2, 0.0)
    out = jnp.dot(h2.astype(jnp.bfloat16), w3,
                  preferred_element_type=jnp.float32) + b3
    return out[:, :N_OUT]


# ----------------------------------------------------------------------------
if __name__ == "__main__":
    key = jax.random.PRNGKey(0)
    k_img, k_tab, k_par = jax.random.split(key, 3)

    B = 8
    img = jax.random.normal(k_img, (B, 3, 16, 16), jnp.float32)  # unused by forward
    tabular = jax.random.normal(k_tab, (B, F_IN), jnp.float32)

    raw = make_params(k_par)
    prepared = prepare_params(raw)

    out = tabular_model_forward(img, tabular, prepared)
    out = jax.block_until_ready(out)
    assert out.shape == (B, N_OUT), out.shape

    # Tight check against a reference that mirrors the kernel math exactly.
    ref_bf16 = reference_forward_bf16(tabular, prepared)
    assert jnp.allclose(out, ref_bf16, atol=1e-2, rtol=1e-2)

    # Loose check against the full-f32 module semantics (bf16 operand error).
    ref_f32 = reference_forward_f32(tabular, raw)
    assert jnp.allclose(out, ref_f32, atol=5e-2, rtol=5e-2)

    print("KERNEL_OK")
</pallas_src>

<mosaic_0001>
module attributes {stable_mosaic.version = 11 : i64} {
  func.func @_tabular_kernel(%arg0: i32, %arg1: memref<8x32xbf16, #tpu.memory_space<vmem>>, %arg2: memref<32x512xbf16, #tpu.memory_space<vmem>>, %arg3: memref<1x512xf32, #tpu.memory_space<vmem>>, %arg4: memref<512x128xbf16, #tpu.memory_space<vmem>>, %arg5: memref<1x128xf32, #tpu.memory_space<vmem>>, %arg6: memref<128x128xbf16, #tpu.memory_space<vmem>>, %arg7: memref<1x128xf32, #tpu.memory_space<vmem>>, %arg8: memref<8x128xf32, #tpu.memory_space<vmem>>) attributes {dimension_semantics = [#tpu.dimension_semantics<parallel>], iteration_bounds = array<i64: 1>, scalar_prefetch = 0 : i64, scratch_operands = 0 : i64, tpu.core_type = #tpu.core_type<tc>, window_params = [{transform_indices = @transform_0, window_bounds = array<i64: 8, 32>}, {pipeline_mode = #tpu.pipeline_mode<synchronous>, transform_indices = @transform_1, window_bounds = array<i64: 32, 512>}, {pipeline_mode = #tpu.pipeline_mode<synchronous>, transform_indices = @transform_2, window_bounds = array<i64: 1, 512>}, {pipeline_mode = #tpu.pipeline_mode<synchronous>, transform_indices = @transform_3, window_bounds = array<i64: 512, 128>}, {pipeline_mode = #tpu.pipeline_mode<synchronous>, transform_indices = @transform_4, window_bounds = array<i64: 1, 128>}, {pipeline_mode = #tpu.pipeline_mode<synchronous>, transform_indices = @transform_5, window_bounds = array<i64: 128, 128>}, {pipeline_mode = #tpu.pipeline_mode<synchronous>, transform_indices = @transform_6, window_bounds = array<i64: 1, 128>}, {transform_indices = @transform_7, window_bounds = array<i64: 8, 128>}]} {
    %c0 = arith.constant 0 : index
    %c0_0 = arith.constant 0 : index
    %0 = vector.load %arg1[%c0, %c0_0] : memref<8x32xbf16, #tpu.memory_space<vmem>>, vector<8x32xbf16>
    %c0_1 = arith.constant 0 : index
    %c0_2 = arith.constant 0 : index
    %1 = vector.load %arg2[%c0_1, %c0_2] : memref<32x512xbf16, #tpu.memory_space<vmem>>, vector<32x512xbf16>
    %cst = arith.constant dense<0.000000e+00> : vector<8x512xf32>
    %2 = tpu.matmul %0, %1, %cst {dimension_numbers = #tpu.dot_dimension_numbers<[1], [0], [0], [1], [0, 0, 1, 1], [], []>} : vector<8x32xbf16>, vector<32x512xbf16>, vector<8x512xf32> -> vector<8x512xf32>
    %c0_3 = arith.constant 0 : index
    %c0_4 = arith.constant 0 : index
    %3 = vector.load %arg3[%c0_3, %c0_4] : memref<1x512xf32, #tpu.memory_space<vmem>>, vector<1x512xf32>
    %4 = vector.broadcast %3 : vector<1x512xf32> to vector<8x512xf32>
    %5 = arith.addf %2, %4 : vector<8x512xf32>
    %cst_5 = arith.constant 0.000000e+00 : f32
    %6 = vector.broadcast %cst_5 : f32 to vector<8x512xf32>
    %7 = arith.maximumf %5, %6 : vector<8x512xf32>
    %8 = arith.truncf %7 : vector<8x512xf32> to vector<8x512xbf16>
    %c0_6 = arith.constant 0 : index
    %c0_7 = arith.constant 0 : index
    %9 = vector.load %arg4[%c0_6, %c0_7] : memref<512x128xbf16, #tpu.memory_space<vmem>>, vector<512x128xbf16>
    %cst_8 = arith.constant dense<0.000000e+00> : vector<8x128xf32>
    %10 = tpu.matmul %8, %9, %cst_8 {dimension_numbers = #tpu.dot_dimension_numbers<[1], [0], [0], [1], [0, 0, 1, 1], [], []>} : vector<8x512xbf16>, vector<512x128xbf16>, vector<8x128xf32> -> vector<8x128xf32>
    %c0_9 = arith.constant 0 : index
    %c0_10 = arith.constant 0 : index
    %11 = vector.load %arg5[%c0_9, %c0_10] : memref<1x128xf32, #tpu.memory_space<vmem>>, vector<1x128xf32>
    %12 = vector.broadcast %11 : vector<1x128xf32> to vector<8x128xf32>
    %13 = arith.addf %10, %12 : vector<8x128xf32>
    %cst_11 = arith.constant 0.000000e+00 : f32
    %14 = vector.broadcast %cst_11 : f32 to vector<8x128xf32>
    %15 = arith.maximumf %13, %14 : vector<8x128xf32>
    %16 = arith.truncf %15 : vector<8x128xf32> to vector<8x128xbf16>
    %c0_12 = arith.constant 0 : index
    %c0_13 = arith.constant 0 : index
    %17 = vector.load %arg6[%c0_12, %c0_13] : memref<128x128xbf16, #tpu.memory_space<vmem>>, vector<128x128xbf16>
    %cst_14 = arith.constant dense<0.000000e+00> : vector<8x128xf32>
    %18 = tpu.matmul %16, %17, %cst_14 {dimension_numbers = #tpu.dot_dimension_numbers<[1], [0], [0], [1], [0, 0, 1, 1], [], []>} : vector<8x128xbf16>, vector<128x128xbf16>, vector<8x128xf32> -> vector<8x128xf32>
    %c0_15 = arith.constant 0 : index
    %c0_16 = arith.constant 0 : index
    %19 = vector.load %arg7[%c0_15, %c0_16] : memref<1x128xf32, #tpu.memory_space<vmem>>, vector<1x128xf32>
    %20 = vector.broadcast %19 : vector<1x128xf32> to vector<8x128xf32>
    %21 = arith.addf %18, %20 : vector<8x128xf32>
    %c0_17 = arith.constant 0 : index
    %c0_18 = arith.constant 0 : index
    %22 = vector.load %arg8[%c0_17, %c0_18] : memref<8x128xf32, #tpu.memory_space<vmem>>, vector<8x128xf32>
    tpu.vector_store %arg8[%c0_17, %c0_18], %21 {strides = array<i32>} : memref<8x128xf32, #tpu.memory_space<vmem>>, vector<8x128xf32>,
    return
  }
  func.func @transform_0(%arg0: i32) -> (i32, i32) {
    %c0_i32 = arith.constant 0 : i32
    %c0_i32_0 = arith.constant 0 : i32
    return %arg0, %c0_i32 : i32, i32
  }
  func.func @transform_1(%arg0: i32) -> (i32, i32) {
    %c0_i32 = arith.constant 0 : i32
    %c0_i32_0 = arith.constant 0 : i32
    %c0_i32_1 = arith.constant 0 : i32
    return %c0_i32, %c0_i32_0 : i32, i32
  }
  func.func @transform_2(%arg0: i32) -> (i32, i32) {
    %c0_i32 = arith.constant 0 : i32
    %c0_i32_0 = arith.constant 0 : i32
    %c0_i32_1 = arith.constant 0 : i32
    return %c0_i32, %c0_i32_0 : i32, i32
  }
  func.func @transform_3(%arg0: i32) -> (i32, i32) {
    %c0_i32 = arith.constant 0 : i32
    %c0_i32_0 = arith.constant 0 : i32
    %c0_i32_1 = arith.constant 0 : i32
    return %c0_i32, %c0_i32_0 : i32, i32
  }
  func.func @transform_4(%arg0: i32) -> (i32, i32) {
    %c0_i32 = arith.constant 0 : i32
    %c0_i32_0 = arith.constant 0 : i32
    %c0_i32_1 = arith.constant 0 : i32
    return %c0_i32, %c0_i32_0 : i32, i32
  }
  func.func @transform_5(%arg0: i32) -> (i32, i32) {
    %c0_i32 = arith.constant 0 : i32
    %c0_i32_0 = arith.constant 0 : i32
    %c0_i32_1 = arith.constant 0 : i32
    return %c0_i32, %c0_i32_0 : i32, i32
  }
  func.func @transform_6(%arg0: i32) -> (i32, i32) {
    %c0_i32 = arith.constant 0 : i32
    %c0_i32_0 = arith.constant 0 : i32
    %c0_i32_1 = arith.constant 0 : i32
    return %c0_i32, %c0_i32_0 : i32, i32
  }
  func.func @transform_7(%arg0: i32) -> (i32, i32) {
    %c0_i32 = arith.constant 0 : i32
    %c0_i32_0 = arith.constant 0 : i32
    return %arg0, %c0_i32 : i32, i32
  }
}

</mosaic_0001>

<bundles_post_ra>
// kernel: tpu_custom_call.1
= control target key start
LH: loop header
LB: loop body
LE: loop exit
PB: predicated region body
PF: predicated region fallthrough
CT: control target
= control target key end

     0   :  { %12 = vsyncpa [#allocation3], 0  ;;  %s1150_s0 = inlined_call_operand.hbm [shape: bf16[8,32], index: 0, kind: input, shape index: {}]   ;;  %s1151_s1 = inlined_call_operand.hbm [shape: bf16[32,512], index: 1, kind: input, shape index: {}]   ;;  %s1152_s2 = inlined_call_operand.vmem [shape: f32[1,512], index: 2, kind: input, shape index: {}]   ;;  %s1153_s3 = inlined_call_operand.hbm [shape: bf16[512,128], index: 3, kind: input, shape index: {}]   ;;  %s1154_s4 = inlined_call_operand.vmem [shape: f32[1,128], index: 4, kind: input, shape index: {}]   ;;  %s1155_s5 = inlined_call_operand.hbm [shape: bf16[128,128], index: 5, kind: input, shape index: {}]   ;;  %s1156_s6 = inlined_call_operand.vmem [shape: f32[1,128], index: 6, kind: input, shape index: {}]   ;;  %s1157_s7 = inlined_call_operand.hbm [shape: f32[8,128], index: 7, kind: output, shape index: {}]  }
   0x1   :  { %13 = vsyncpa [#allocation6], 0 }
   0x2   :  { %14 = vsyncpa [#allocation9], 0 }
   0x3   :  { %15 = vsyncpa [#allocation4], 0  ;;  %s1027_s24 = smov [#allocation5]   ;;  %s909_s28 = scalar_lea.hbm %s1151_s1, 1024 }
   0x4   :  { %s31_s25 = sshll.u32 %s1027_s24, 4  ;;  %p910_p0 = scmp.ne.s32.totalorder %s1151_s1, %s909_s28  ;;  %s32_s25 = int_to_ptr.vmem [resolvable:$true] %s31_s25 }
   0x5   :  { %p913_p1 = scmp.lt.u32.totalorder %s909_s28, %s1151_s1 }
   0x7   :  { %p915_p2 = pnand %p913_p1, %p910_p0 }
   0x9   :  { %918 = shalt.err (!%p915_p2)
}
   0xa   :  { %s919_s10 = scalar_lea.vmem %s32_s25, 1024  ;;  %p924_p4 = scmp.lt.s32.totalorder %s32_s25, %s32_s25 }
   0xb   :  { %p920_p3 = scmp.ne.s32.totalorder %s32_s25, %s919_s10  ;;  %p925_p5 = scmp.lt.s32.totalorder %s919_s10, %s919_s10 }
   0xd   :  { %p926_p6 = por %p925_p5, %p924_p4 }
   0xf   :  { %p927_p7 = pnand %p926_p6, %p920_p3 }
  0x11   :  { %930 = shalt.err (!%p927_p7)
}
  0x12   :  { %s1028_s11 = smov 256   ;;  %s1029_s12 = smov 16  }
  0x13   :  { %37 = dma.hbm_to_vmem [thread:$0]  %s1151_s1, 1024, %s32_s25, [#allocation6], %s1028_s11, %s1028_s11, %s1029_s12  }
  0x14   :  { %s1030_s15 = smov [#allocation2]   ;;  %s1031_s17 = smov [#allocation7]  }
  0x15   :  { %s22_s16 = sshll.u32 %s1030_s15, 4  ;;  %s45_s18 = sshll.u32 %s1031_s17, 4  ;;  %s23_s16 = int_to_ptr.vmem [resolvable:$true] %s22_s16  ;;  %s46_s18 = int_to_ptr.vmem [resolvable:$true] %s45_s18 }
  0x16   :  { %s931_s21 = scalar_lea.hbm %s1150_s0, 64 }
  0x17   :  { %p932_p8 = scmp.ne.s32.totalorder %s1150_s0, %s931_s21  ;;  %p935_p9 = scmp.lt.u32.totalorder %s931_s21, %s1150_s0 }
  0x19   :  { %p937_p10 = pnand %p935_p9, %p932_p8 }
  0x1b   :  { %940 = shalt.err (!%p937_p10)
}
  0x1c   :  { %s941_s1 = scalar_lea.vmem %s23_s16, 64  ;;  %p946_p12 = scmp.lt.s32.totalorder %s23_s16, %s23_s16 }
  0x1d   :  { %p942_p11 = scmp.ne.s32.totalorder %s23_s16, %s941_s1  ;;  %p947_p13 = scmp.lt.s32.totalorder %s941_s1, %s941_s1 }
  0x1f   :  { %p948_p0 = por %p947_p13, %p946_p12 }
  0x21   :  { %p949_p1 = pnand %p948_p0, %p942_p11 }
  0x23   :  { %952 = shalt.err (!%p949_p1)
}
  0x24   :  { %25 = dma.hbm_to_vmem [thread:$0]  %s1150_s0, 64, %s23_s16, [#allocation3]  }
  0x25   :  { %s953_s30 = scalar_lea.hbm %s1153_s3, 4096 }
  0x26   :  { %p954_p2 = scmp.ne.s32.totalorder %s1153_s3, %s953_s30  ;;  %p957_p3 = scmp.lt.u32.totalorder %s953_s30, %s1153_s3 }
  0x28   :  { %p959_p4 = pnand %p957_p3, %p954_p2 }
  0x2a   :  { %962 = shalt.err (!%p959_p4)
}
  0x2b   :  { %s963_s12 = scalar_lea.vmem %s46_s18, 4096  ;;  %p968_p6 = scmp.lt.s32.totalorder %s46_s18, %s46_s18 }
  0x2c   :  { %p964_p5 = scmp.ne.s32.totalorder %s46_s18, %s963_s12  ;;  %p969_p7 = scmp.lt.s32.totalorder %s963_s12, %s963_s12 }
  0x2e   :  { %p970_p8 = por %p969_p7, %p968_p6 }
  0x30   :  { %p971_p9 = pnand %p970_p8, %p964_p5 }
  0x32   :  { %974 = shalt.err (!%p971_p9)
}
  0x33   :  { %s1032_s0 = smov 64   ;;  %s1033_s13 = smov 4  }
  0x34   :  { %51 = dma.hbm_to_vmem [thread:$0]  %s1153_s3, 4096, %s46_s18, [#allocation6], %s1032_s0, %s1032_s0, %s1033_s13  }
  0x35   :  { %s1034_s16 = smov [#allocation8]   ;;  %s975_s21 = scalar_lea.hbm %s1155_s5, 1024 }
  0x36   :  { %s59_s17 = sshll.u32 %s1034_s16, 4  ;;  %p976_p10 = scmp.ne.s32.totalorder %s1155_s5, %s975_s21  ;;  %s60_s17 = int_to_ptr.vmem [resolvable:$true] %s59_s17 }
  0x37   :  { %p979_p11 = scmp.lt.u32.totalorder %s975_s21, %s1155_s5 }
  0x39   :  { %p981_p12 = pnand %p979_p11, %p976_p10 }
  0x3b   :  { %984 = shalt.err (!%p981_p12)
}
  0x3c   :  { %s985_s1 = scalar_lea.vmem %s60_s17, 1024  ;;  %p990_p0 = scmp.lt.s32.totalorder %s60_s17, %s60_s17 }
  0x3d   :  { %p986_p13 = scmp.ne.s32.totalorder %s60_s17, %s985_s1  ;;  %p991_p1 = scmp.lt.s32.totalorder %s985_s1, %s985_s1 }
  0x3f   :  { %p992_p2 = por %p991_p1, %p990_p0 }
  0x41   :  { %p993_p3 = pnand %p992_p2, %p986_p13 }
  0x43   :  { %996 = shalt.err (!%p993_p3)
}
  0x44   :  { %65 = dma.hbm_to_vmem [thread:$0]  %s1155_s5, 1024, %s60_s17, [#allocation9], %s1032_s0, %s1032_s0, %s1033_s13  }
  0x45   :  { %1019 = dma.done.wait [#allocation3], 64  }
  0x46   :  { %1020 = vsyncadd [#allocation3], 4294967232 }
  0x47   :  { %1021 = dma.done.wait [#allocation6], 5120  }
  0x48   :  { %1022 = vsyncadd [#allocation6], 4294962176 }
  0x49   :  { %1023 = dma.done.wait [#allocation9], 1024  }
  0x4a   :  { %1024 = vsyncadd [#allocation9], 4294966272  ;;  %v1035_v0 = vmov 0   ;;  %v857_v1 = vld [vmem:[#allocation5 + $0x4] ss:$16 sps:$4 sm:$0xff]   ;;  %vm152_vm0 = vcmask 261120   ;;  %v92_v43 = vlaneseq }
  0x4b   :  { %188 = vmatprep.mubr.bf16.mxu1 %v1035_v0  ;;  %v859_v2 = vld [vmem:[#allocation5] ss:$16 sps:$4 sm:$0xff]   ;;  %156 = vmatprep.subr.bf16.mxu1 %v857_v1  ;;  %v860_v3 = vld [vmem:[#allocation5 + $0x24] ss:$16 sps:$4 sm:$0xff]   ;;  %v865_v5 = vld [vmem:[#allocation5 + $0xc] ss:$16 sps:$4 sm:$0xff]  }
  0x4c   :  { %157 = vmatpush1.bf16.msra.mxu1 %v859_v2  ;;  %v862_v4 = vld [vmem:[#allocation5 + $0x20] ss:$16 sps:$4 sm:$0xff]   ;;  %v81_v6 = vld [vmem:[#allocation2] sm:$0xf]  ;;  %v863_v7 = vld [vmem:[#allocation5 + $0x8] ss:$16 sps:$4 sm:$0xff]  }
  0x4d   :  { %158 = vmatprep.subr.bf16.mxu1 %v860_v3  ;;  %v868_v8 = vld [vmem:[#allocation5 + $0x2c] ss:$16 sps:$4 sm:$0xff]   ;;  %v869_v9 = vld [vmem:[#allocation7 + $0x40] sm:$0xff]   ;;  %v873_v13 = vld [vmem:[#allocation7 + $0x50] sm:$0xff]   ;;  %v1036_v42 = vmov 0.0   ;;  %v93_v44 = vshrl.u32 %v92_v43, 7 }
  0x4e   :  { %v870_v10 = vld [vmem:[#allocation7] sm:$0xff]   ;;  %772 = vmatprep.subr.bf16.mxu0 %v869_v9  ;;  %v871_v11 = vld [vmem:[#allocation7 + $0x48] sm:$0xff]   ;;  %v875_v16 = vld [vmem:[#allocation7 + $0x10] sm:$0xff]   ;;  %vm1037_vm1 = vmmov 0   ;;  %s1038_s30 = smov [#allocation10]  }
  0x4f   :  { %773 = vmatpush3.bf16.msra.mxu0 %v870_v10  ;;  %v872_v12 = vld [vmem:[#allocation7 + $0x8] sm:$0xff]   ;;  %v874_v15 = vld [vmem:[#allocation7 + $0xc0] sm:$0xff]   ;;  %v877_v17 = vld [vmem:[#allocation7 + $0x58] sm:$0xff]   ;;  %v94_v45 = vsub.s32 0, %v93_v44  ;;  %v98_v47 = vsub.s32 1, %v93_v44  ;;  %v102_v53 = vsub.s32 2, %v93_v44 }
  0x50   :  { %159 = vmatpush1.bf16.msra.mxu1 %v862_v4  ;;  %774 = vmatprep.subr.bf16.mxu0 %v871_v11  ;;  %v866_v14 = vld [vmem:[#allocation5 + $0x28] ss:$16 sps:$4 sm:$0xff]   ;;  %v876_v18 = vld [vmem:[#allocation7 + $0x80] sm:$0xff]   ;;  %v882_v23 = vld [vmem:[#allocation7 + $0xd0] sm:$0xff]   ;;  %v106_v56 = vsub.s32 3, %v93_v44  ;;  %s709_s8 = sshll.u32 %s1038_s30, 4  ;;  %s710_s8 = int_to_ptr.vmem [resolvable:$true] %s709_s8 }
  0x51   :  { %197 = vmatprep.subr.bf16.mxu1 %v865_v5  ;;  %v878_v19 = vld [vmem:[#allocation7 + $0xc8] sm:$0xff]   ;;  %v879_v20 = vld [vmem:[#allocation7 + $0x18] sm:$0xff]   ;;  %v881_v21 = vld [vmem:[#allocation7 + $0x60] sm:$0xff]   ;;  %p1002_p5 = scmp.lt.s32.totalorder %s710_s8, %s710_s8 }
  0x52   :  { %v880_v22 = vld [vmem:[#allocation7 + $0x88] sm:$0xff]   ;;  %v883_v24 = vld [vmem:[#allocation7 + $0x20] sm:$0xff]   ;;  %v884_v26 = vld [vmem:[#allocation7 + $0x90] sm:$0xff]  }
  0x53   :  { %728 = vmatmul.mubr.msk.bf16.vlgmr.msra.gmra.mrb[0].mxu1 %vm152_vm0, %v81_v6  ;;  %775 = vmatpush3.bf16.msra.mxu0 %v872_v12  ;;  %v885_v25 = vld [vmem:[#allocation7 + $0x68] sm:$0xff]   ;;  %v886_v27 = vld [vmem:[#allocation7 + $0xd8] sm:$0xff]   ;;  %v889_v30 = vld [vmem:[#allocation7 + $0x70] sm:$0xff]  }
  0x54   :  { %198 = vmatpush1.bf16.msra.mxu1 %v863_v7  ;;  %229 = vmatprep.mubr.bf16.mxu1 %v1035_v0  ;;  %v887_v28 = vld [vmem:[#allocation7 + $0x28] sm:$0xff]   ;;  %v888_v29 = vld [vmem:[#allocation7 + $0x98] sm:$0xff]   ;;  %v890_v31 = vld [vmem:[#allocation7 + $0xe0] sm:$0xff]  }
  0x55   :  { %199 = vmatprep.subr.bf16.mxu1 %v868_v8  ;;  %776 = vmatprep.subr.bf16.mxu0 %v873_v13  ;;  %v891_v32 = vld [vmem:[#allocation7 + $0x30] sm:$0xff]   ;;  %v892_v33 = vld [vmem:[#allocation7 + $0xa0] sm:$0xff]   ;;  %v893_v34 = vld [vmem:[#allocation7 + $0x78] sm:$0xff]  }
  0x56   :  { %v894_v35 = vld [vmem:[#allocation7 + $0xe8] sm:$0xff]   ;;  %v895_v36 = vld [vmem:[#allocation7 + $0x38] sm:$0xff]   ;;  %v897_v38 = vld [vmem:[#allocation7 + $0xf0] sm:$0xff]  }
  0x57   :  { %777 = vmatpush3.bf16.msra.mxu0 %v875_v16  ;;  %v896_v37 = vld [vmem:[#allocation7 + $0xa8] sm:$0xff]   ;;  %v898_v39 = vld [vmem:[#allocation7 + $0xb0] sm:$0xff]   ;;  %v899_v40 = vld [vmem:[#allocation7 + $0xf8] sm:$0xff]  }
  0x58   :  { %200 = vmatpush1.bf16.msra.mxu1 %v866_v14  ;;  %778 = vmatprep.subr.bf16.mxu0 %v877_v17  ;;  %v900_v41 = vld [vmem:[#allocation7 + $0xb8] sm:$0xff]   ;;  %v901_v63 = vld [vmem:[#allocation8] sm:$0xff]   ;;  %v903_v11 = vld [vmem:[#allocation8 + $0x10] sm:$0xff]  }
  0x59   :  { %794 = vmatprep.subr.bf16.mxu1 %v874_v15  ;;  %v90_v46 = vld [vmem:[%s1152_s2] sm:$0xf]  ;;  %v905_v14 = vld [vmem:[#allocation8 + $0x20] sm:$0xff]   ;;  %v906_v15 = vld [vmem:[#allocation8 + $0x28] sm:$0xff]  }
  0x5a   :  { %v95_v48 = vrot.slane %v90_v46, %v94_v45  ;;  %v99_v49 = vrot.slane %v90_v46, %v98_v47  ;;  %v103_v60 = vrot.slane %v90_v46, %v102_v53  ;;  %v107_v62 = vrot.slane %v90_v46, %v106_v56  ;;  %v904_v13 = vld [vmem:[#allocation8 + $0x18] sm:$0xff]   ;;  %v907_v16 = vld [vmem:[#allocation8 + $0x30] sm:$0xff]  }
  0x5b   :  { %729 = vmatmul.mubr.msk.bf16.vlgmr.msra.gmra.mrb[4].mxu1 %vm152_vm0, %v81_v6  ;;  %779 = vmatpush3.bf16.msra.mxu0 %v879_v20  ;;  %v902_v6 = vld [vmem:[#allocation8 + $0x8] sm:$0xff]   ;;  %v908_v17 = vld [vmem:[#allocation8 + $0x38] sm:$0xff]  }
  0x5c   :  { %795 = vmatpush3.bf16.msra.mxu1 %v876_v18  ;;  %780 = vmatprep.subr.bf16.mxu0 %v881_v21 }
  0x5d   :  { %796 = vmatprep.subr.bf16.mxu1 %v878_v19 }
  0x5f   :  { %781 = vmatpush3.bf16.msra.mxu0 %v883_v24 }
  0x60   :  { %797 = vmatpush3.bf16.msra.mxu1 %v880_v22  ;;  %782 = vmatprep.subr.bf16.mxu0 %v885_v25 }
  0x61   :  { %798 = vmatprep.subr.bf16.mxu1 %v882_v23  ;;  %v730_v23 = vld [vmem:[%s1154_s4] ss:$0 sm:$0xff]  ;;  %s997_s4 = scalar_lea.vmem %s710_s8, 128 }
  0x62   :  { %p998_p4 = scmp.ne.s32.totalorder %s710_s8, %s997_s4  ;;  %p1003_p6 = scmp.lt.s32.totalorder %s997_s4, %s997_s4 }
  0x63   :  { %783 = vmatpush3.bf16.msra.mxu0 %v887_v28 }
  0x64   :  { %799 = vmatpush3.bf16.msra.mxu1 %v884_v26  ;;  %784 = vmatprep.subr.bf16.mxu0 %v889_v30  ;;  %p1004_p7 = por %p1003_p6, %p1002_p5 }
  0x65   :  { %800 = vmatprep.subr.bf16.mxu1 %v886_v27 }
  0x66   :  { %p1005_p8 = pnand %p1004_p7, %p998_p4 }
  0x67   :  { %785 = vmatpush3.bf16.msra.mxu0 %v891_v32 }
  0x68   :  { %801 = vmatpush3.bf16.msra.mxu1 %v888_v29  ;;  %786 = vmatprep.subr.bf16.mxu0 %v893_v34 }
  0x69   :  { %802 = vmatprep.subr.bf16.mxu1 %v890_v31 }
  0x6b   :  { %787 = vmatpush3.bf16.msra.mxu0 %v895_v36 }
  0x6c   :  { %803 = vmatpush3.bf16.msra.mxu1 %v892_v33  ;;  %825 = vmatprep.subr.bf16.mxu0 %v1036_v42  ;;  %v763_v33 = vld [vmem:[%s1156_s6] ss:$0 sm:$0xff] }
  0x6d   :  { %804 = vmatprep.subr.bf16.mxu1 %v894_v35 }
  0x70   :  { %805 = vmatpush3.bf16.msra.mxu1 %v896_v37 }
  0x71   :  { %806 = vmatprep.subr.bf16.mxu1 %v897_v38 }
  0x74   :  { %807 = vmatpush3.bf16.msra.mxu1 %v898_v39 }
  0x75   :  { %808 = vmatprep.subr.bf16.mxu1 %v899_v40 }
  0x78   :  { %809 = vmatpush3.bf16.msra.mxu1 %v900_v41 }
 0x126   :  { %v190_v50 = vpop.f32.mrb[0].mxu1 }
 0x127   :  { %v191_v51 = vadd.f32 %v190_v50, %v95_v48  ;;  %v192_v52 = vpop.f32.mrb[1].mxu1 }
 0x128   :  { %v193_v54 = vadd.f32 %v192_v52, %v99_v49  ;;  %v194_v55 = vpop.f32.mrb[2].mxu1 }
 0x129   :  { %v238_v57 = vmax.f32 %v191_v51, 0.0  ;;  %v195_v58 = vpop.f32.mrb[3].mxu1 }
 0x12a   :  { %v239_v59 = vmax.f32 %v193_v54, 0.0 }
 0x12b   :  { %v242_v0 = vpack.c.bf16 %v238_v57, %v238_v57 }
 0x12c   :  { %v243_v61 = vpack.c.bf16 %v239_v59, %v239_v59 }
 0x12e   :  { %v231_v1 = vpop.f32.mrb[4].mxu1  ;;  %541 = vmatprep.mubr.bf16.mxu0 %v243_v61 }
 0x12f   :  { %v232_v2 = vadd.f32 %v231_v1, %v103_v60  ;;  %v233_v3 = vpop.f32.mrb[5].mxu1  ;;  %542 = vmatmul.mubr.bf16.vlgmr.msra.gmra.mrb[0].mxu0 %v242_v0 }
 0x130   :  { %v234_v4 = vadd.f32 %v233_v3, %v107_v62  ;;  %v235_v5 = vpop.f32.mrb[6].mxu1  ;;  %826 = vmatpush3.bf16.msra.mxu0 %v901_v63  ;;  %841 = vmatprep.mubr.msk.bf16.mxu0 %vm1037_vm1, %v1036_v42 }
 0x131   :  { %v240_v7 = vmax.f32 %v232_v2, 0.0  ;;  %v236_v8 = vpop.f32.mrb[7].mxu1  ;;  %827 = vmatprep.subr.bf16.mxu0 %v1036_v42 }
 0x132   :  { %v241_v9 = vmax.f32 %v234_v4, 0.0 }
 0x133   :  { %v244_v12 = vpack.c.bf16 %v240_v7, %v240_v7 }
 0x134   :  { %v245_v10 = vpack.c.bf16 %v241_v9, %v241_v9  ;;  %828 = vmatpush3.bf16.msra.mxu0 %v902_v6 }
 0x135   :  { %829 = vmatprep.subr.bf16.mxu0 %v1036_v42 }
 0x136   :  { %581 = vmatprep.mubr.bf16.mxu1 %v245_v10 }
 0x137   :  { %582 = vmatmul.mubr.bf16.vlgmr.msra.gmra.mrb[8].mxu1 %v244_v12 }
 0x138   :  { %830 = vmatpush3.bf16.msra.mxu0 %v903_v11 }
 0x139   :  { %831 = vmatprep.subr.bf16.mxu0 %v1036_v42 }
 0x13c   :  { %832 = vmatpush3.bf16.msra.mxu0 %v904_v13 }
 0x13d   :  { %833 = vmatprep.subr.bf16.mxu0 %v1036_v42 }
 0x140   :  { %834 = vmatpush3.bf16.msra.mxu0 %v905_v14 }
 0x141   :  { %835 = vmatprep.subr.bf16.mxu0 %v1036_v42 }
 0x144   :  { %836 = vmatpush3.bf16.msra.mxu0 %v906_v15 }
 0x145   :  { %837 = vmatprep.subr.bf16.mxu0 %v1036_v42 }
 0x148   :  { %838 = vmatpush3.bf16.msra.mxu0 %v907_v16 }
 0x149   :  { %839 = vmatprep.subr.bf16.mxu0 %v1036_v42 }
 0x14c   :  { %840 = vmatpush3.bf16.msra.mxu0 %v908_v17 }
 0x202   :  { %v788_v18 = vpop.f32.mrb[0].mxu0 }
 0x203   :  { %v789_v19 = vpop.f32.mrb[1].mxu0 }
 0x204   :  { %v790_v20 = vadd.f32 %v789_v19, %v788_v18  ;;  %v791_v21 = vpop.f32.mrb[2].mxu0 }
 0x205   :  { %v792_v22 = vpop.f32.mrb[3].mxu0 }
 0x206   :  { %v544_v26 = vadd.f32 %v790_v20, %v730_v23 }
 0x20a   :  { %v810_v24 = vpop.f32.mrb[8].mxu1 }
 0x20b   :  { %v811_v25 = vpop.f32.mrb[9].mxu1 }
 0x20c   :  { %v812_v27 = vadd.f32 %v811_v25, %v810_v24  ;;  %v813_v28 = vpop.f32.mrb[10].mxu1 }
 0x20d   :  { %v814_v29 = vpop.f32.mrb[11].mxu1 }
 0x20e   :  { %v584_v30 = vadd.f32 %v812_v27, %v544_v26 }
 0x210   :  { %v589_v31 = vmax.f32 %v584_v30, 0.0 }
 0x212   :  { %v590_v32 = vpack.c.bf16 %v589_v31, %v589_v31 }
 0x214   :  { %842 = vmatmul.mubr.bf16.vlgmr.msra.gmra.mrb[4].mxu0 %v590_v32 }
 0x2e7   :  { %v696_v34 = vpop.f32.mrb[4].mxu0 }
 0x2e8   :  { %v697_v35 = vadd.f32 %v763_v33, %v696_v34  ;;  %v843_v36 = vpop.f32.mrb[5].mxu0 }
 0x2e9   :  { %v699_v37 = vpop.f32.mrb[6].mxu0 }
 0x2ea   :  { %702 = vst [vmem:[#allocation10] sm:$0xff] %v697_v35  ;;  %v844_v38 = vpop.f32.mrb[7].mxu0 }
 0x2eb   :  { %1008 = shalt.err (!%p1005_p8)
}
 0x2ec   :  { %s1009_s6 = scalar_lea.hbm %s1157_s7, 128 }
 0x2ed   :  { %p1010_p9 = scmp.ne.s32.totalorder %s1157_s7, %s1009_s6  ;;  %p1013_p10 = scmp.lt.u32.totalorder %s1009_s6, %s1157_s7 }
 0x2ef   :  { %p1015_p11 = pnand %p1013_p10, %p1010_p9 }
 0x2f1   :  { %1018 = shalt.err (!%p1015_p11)
}
 0x2f2   :  { %712 = dma.vmem_to_hbm [thread:$0]  %s710_s8, 128, %s1157_s7, [#allocation4]  }
 0x2f3   :  { %1025 = dma.done.wait [#allocation4], 128  }
 0x2f4   :  { %1026 = vsyncadd [#allocation4], 4294967168 }
 0x2f5   :  { %716 = vsyncpa [#allocation3], 1 }
 0x2f6   :  { %717 = vsyncpa [#allocation6], 1 }
 0x2f7   :  { %718 = vsyncpa [#allocation9], 1 }
 0x2f8   :  { %719 = vsyncpa [#allocation4], 1 }

</bundles_post_ra>
